<compile_context>
chip_gen: v7x
topology: tpu7x:2x2x1
jax: 0.10.0
libtpu: 0.0.40
codegen_flags: <defaults>
</compile_context>

<pallas_src>
import jax
import jax.numpy as jnp
from jax.experimental import pallas as pl
from jax.experimental.pallas import tpu as pltpu


def _copy_kernel(x_ref, o_ref):
    # Pure pass-through: the Autoencoder stub has no layers, so the only
    # "compute" is moving the tile through VMEM unchanged.
    o_ref[...] = x_ref[...]


def _cdiv(a, b):
    return -(-a // b)


# dtype itemsize -> packed sublane minimum (second-to-last dim granularity).
_SUBLANE_MIN = {4: 8, 2: 16, 1: 32}

# Target ~4 MiB tiles: with double-buffered input + output that is ~16 MiB of
# live VMEM, under the 32 MiB default scoped limit on every TPU generation
# (including v7x with its 64 MiB physical VMEM per TensorCore).
_TARGET_TILE_BYTES = 4 * 1024 * 1024

_LANE_CANDIDATES = (8192, 4096, 2048, 1024, 512, 256, 128)


def _pick_lane(total):
    """Widest lane width (multiple of 128) that divides `total` exactly."""
    for lane in _LANE_CANDIDATES:
        if total % lane == 0:
            return lane
    return None


def _pick_tile_rows_and_grid(rows, lane, itemsize, sub_min):
    """Tile rows (multiple of sub_min) and grid length for a (rows, lane) slab."""
    bytes_per_row = lane * itemsize
    max_tile = max(sub_min, (_TARGET_TILE_BYTES // bytes_per_row) // sub_min * sub_min)

    if rows <= max_tile:
        # Single full block: block shape == full array dims, always legal.
        return rows, 1

    tile = max_tile
    grid = _cdiv(rows, tile)

    # v7x bias: prefer an even number of grid steps so the "parallel" axis
    # splits evenly across the 2 TensorCores (measured no-op on v5e/v6e).
    if grid % 2 == 1:
        alt_tile = _cdiv(_cdiv(rows, grid + 1), sub_min) * sub_min
        alt_tile = min(max(alt_tile, sub_min), max_tile)
        alt_grid = _cdiv(rows, alt_tile)
        if alt_grid % 2 == 0:
            tile, grid = alt_tile, alt_grid

    return tile, grid


def pallas_identity(x, *, in_place=False):
    """Tiled identity copy through a Pallas TPU kernel.

    Reshapes the input to a lane-dense 2-D slab (rows, lane) with lane a wide
    multiple of 128, copies it in large full-width tiles on the TensorCore,
    and restores the original shape.  No padding / slicing / dtype casts are
    emitted when the element count is a multiple of 128 (the common case).

    Set `in_place=True` to alias input and output HBM buffers
    (input_output_aliases={0: 0}); only do this when the caller donates `x`.
    """
    orig_shape = x.shape
    total = 1
    for d in orig_shape:
        total *= d
    if total == 0:
        return x

    itemsize = jnp.dtype(x.dtype).itemsize
    sub_min = _SUBLANE_MIN.get(itemsize, 8)

    lane = _pick_lane(total)
    padded_total = total
    if lane is None:
        # TODO(synk): ragged element counts (not a multiple of 128) fall back
        # to a one-off jnp.pad + final slice; a fully in-kernel masked tail
        # would avoid the extra HBM pass but is not needed for this stub.
        lane = 128
        padded_total = _cdiv(total, lane) * lane
        flat = jnp.pad(jnp.ravel(x), (0, padded_total - total))
    else:
        flat = jnp.ravel(x)  # contiguous reshape: no extra HBM pass

    rows = padded_total // lane
    slab = flat.reshape(rows, lane)

    tile_rows, grid = _pick_tile_rows_and_grid(rows, lane, itemsize, sub_min)

    out = pl.pallas_call(
        _copy_kernel,
        out_shape=jax.ShapeDtypeStruct((rows, lane), slab.dtype),
        grid_spec=pltpu.PrefetchScalarGridSpec(
            num_scalar_prefetch=0,
            grid=(grid,),
            in_specs=[pl.BlockSpec((tile_rows, lane), lambda i: (i, 0))],
            out_specs=pl.BlockSpec((tile_rows, lane), lambda i: (i, 0)),
        ),
        compiler_params=pltpu.CompilerParams(
            dimension_semantics=("parallel",),
        ),
        input_output_aliases=({0: 0} if in_place else {}),
    )(slab)

    if padded_total != total:
        out = out.reshape(-1)[:total]
    return out.reshape(orig_shape)


def autoencoder_forward(x, *, debug_exercise_kernel=False):
    """Matches `Autoencoder.forward` exactly: the PyTorch forward body is
    `pass`, so it returns None regardless of input.

    No kernel is launched on this path (the reference does no compute); the
    pass-through kernel can be exercised explicitly via the debug flag.
    """
    if debug_exercise_kernel:
        jax.block_until_ready(pallas_identity(x))
    return None


if __name__ == "__main__":
    key = jax.random.PRNGKey(0)

    # Small NCHW input consistent with an image-autoencoder interface.
    x = jax.random.normal(key, (2, 4, 16, 16), dtype=jnp.float32)
    y = pallas_identity(x)
    jax.block_until_ready(y)
    assert y.shape == x.shape and y.dtype == x.dtype
    assert bool(jnp.all(y == x))

    # Larger input to exercise the wide-lane, multi-step (even) grid path.
    x2 = jax.random.normal(jax.random.PRNGKey(0), (8, 16, 256, 256), dtype=jnp.float32)
    y2 = pallas_identity(x2)
    jax.block_until_ready(y2)
    assert y2.shape == x2.shape and y2.dtype == x2.dtype
    assert bool(jnp.all(y2 == x2))

    # Exact forward semantics of the PyTorch stub: returns None, no kernel run.
    assert autoencoder_forward(x) is None

    print("KERNEL_OK")
</pallas_src>

<mosaic_0001>
module attributes {stable_mosaic.version = 11 : i64} {
  func.func @_copy_kernel(%arg0: i32, %arg1: memref<1x2048xf32, #tpu.memory_space<vmem>>, %arg2: memref<1x2048xf32, #tpu.memory_space<vmem>>) attributes {dimension_semantics = [#tpu.dimension_semantics<parallel>], iteration_bounds = array<i64: 1>, scalar_prefetch = 0 : i64, scratch_operands = 0 : i64, tpu.core_type = #tpu.core_type<tc>, window_params = [{transform_indices = @transform_0, window_bounds = array<i64: 1, 2048>}, {transform_indices = @transform_1, window_bounds = array<i64: 1, 2048>}]} {
    %c0 = arith.constant 0 : index
    %c0_0 = arith.constant 0 : index
    %0 = vector.load %arg1[%c0, %c0_0] : memref<1x2048xf32, #tpu.memory_space<vmem>>, vector<1x2048xf32>
    %c0_1 = arith.constant 0 : index
    %c0_2 = arith.constant 0 : index
    %1 = vector.load %arg2[%c0_1, %c0_2] : memref<1x2048xf32, #tpu.memory_space<vmem>>, vector<1x2048xf32>
    tpu.vector_store %arg2[%c0_1, %c0_2], %0 {strides = array<i32>} : memref<1x2048xf32, #tpu.memory_space<vmem>>, vector<1x2048xf32>,
    return
  }
  func.func @transform_0(%arg0: i32) -> (i32, i32) {
    %c0_i32 = arith.constant 0 : i32
    %c0_i32_0 = arith.constant 0 : i32
    return %arg0, %c0_i32 : i32, i32
  }
  func.func @transform_1(%arg0: i32) -> (i32, i32) {
    %c0_i32 = arith.constant 0 : i32
    %c0_i32_0 = arith.constant 0 : i32
    return %arg0, %c0_i32 : i32, i32
  }
}

</mosaic_0001>

<bundles_post_ra>
// kernel: tpu_custom_call.1
= control target key start
LH: loop header
LB: loop body
LE: loop exit
PB: predicated region body
PF: predicated region fallthrough
CT: control target
= control target key end

     0   :  { %6 = vsyncpa [#allocation3], 0  ;;  %s126_s0 = inlined_call_operand.hbm [shape: f32[1,2048], index: 0, kind: input, shape index: {}]   ;;  %s127_s1 = inlined_call_operand.hbm [shape: f32[1,2048], index: 1, kind: output, shape index: {}]  }
   0x1   :  { %7 = vsyncpa [#allocation4], 0  ;;  %s90_s6 = smov [#allocation2]   ;;  %s42_s10 = scalar_lea.hbm %s126_s0, 256 }
   0x2   :  { %s14_s7 = sshll.u32 %s90_s6, 4  ;;  %p43_p0 = scmp.ne.s32.totalorder %s126_s0, %s42_s10  ;;  %s15_s7 = int_to_ptr.vmem [resolvable:$true] %s14_s7 }
   0x3   :  { %p46_p1 = scmp.lt.u32.totalorder %s42_s10, %s126_s0 }
   0x5   :  { %p48_p2 = pnand %p46_p1, %p43_p0 }
   0x7   :  { %51 = shalt.err (!%p48_p2)
}
   0x8   :  { %s52_s15 = scalar_lea.vmem %s15_s7, 256  ;;  %p57_p4 = scmp.lt.s32.totalorder %s15_s7, %s15_s7 }
   0x9   :  { %p53_p3 = scmp.ne.s32.totalorder %s15_s7, %s52_s15  ;;  %p58_p5 = scmp.lt.s32.totalorder %s52_s15, %s52_s15 }
   0xb   :  { %p59_p6 = por %p58_p5, %p57_p4 }
   0xd   :  { %p60_p7 = pnand %p59_p6, %p53_p3 }
   0xf   :  { %63 = shalt.err (!%p60_p7)
}
  0x10   :  { %17 = dma.hbm_to_vmem [thread:$0]  %s126_s0, 256, %s15_s7, [#allocation3]  }
  0x11   :  { %86 = dma.done.wait [#allocation3], 256  }
  0x12   :  { %87 = vsyncadd [#allocation3], 4294967040  ;;  %s91_s18 = smov [#allocation5]   ;;  %v21_v0 = vld [vmem:[#allocation2] sm:$0xff]  ;;  %v22_v1 = vld [vmem:[#allocation2 + $0x8] sm:$0xff] }
  0x13   :  { %s31_s19 = sshll.u32 %s91_s18, 4  ;;  %23 = vst [vmem:[#allocation5] sm:$0xff] %v21_v0  ;;  %24 = vst [vmem:[#allocation5 + $0x8] sm:$0xff] %v22_v1  ;;  %s32_s19 = int_to_ptr.vmem [resolvable:$true] %s31_s19 }
  0x14   :  { %s64_s20 = scalar_lea.vmem %s32_s19, 256  ;;  %p69_p9 = scmp.lt.s32.totalorder %s32_s19, %s32_s19 }
  0x15   :  { %p65_p8 = scmp.ne.s32.totalorder %s32_s19, %s64_s20  ;;  %p70_p10 = scmp.lt.s32.totalorder %s64_s20, %s64_s20 }
  0x17   :  { %p71_p11 = por %p70_p10, %p69_p9 }
  0x19   :  { %p72_p12 = pnand %p71_p11, %p65_p8 }
  0x1b   :  { %75 = shalt.err (!%p72_p12)
}
  0x1c   :  { %s76_s0 = scalar_lea.hbm %s127_s1, 256 }
  0x1d   :  { %p77_p13 = scmp.ne.s32.totalorder %s127_s1, %s76_s0  ;;  %p80_p0 = scmp.lt.u32.totalorder %s76_s0, %s127_s1 }
  0x1f   :  { %p82_p1 = pnand %p80_p0, %p77_p13 }
  0x21   :  { %85 = shalt.err (!%p82_p1)
}
  0x22   :  { %34 = dma.vmem_to_hbm [thread:$0]  %s32_s19, 256, %s127_s1, [#allocation4]  }
  0x23   :  { %88 = dma.done.wait [#allocation4], 256  }
  0x24   :  { %89 = vsyncadd [#allocation4], 4294967040 }
  0x25   :  { %38 = vsyncpa [#allocation3], 1 }
  0x26   :  { %39 = vsyncpa [#allocation4], 1 }

</bundles_post_ra>
